<compile_context>
chip_gen: v7x
topology: tpu7x:2x2x1
jax: 0.10.0
libtpu: 0.0.40
codegen_flags: <defaults>
</compile_context>

<pallas_src>
import functools

import jax
import jax.numpy as jnp
from jax.experimental import pallas as pl
from jax.experimental.pallas import tpu as pltpu


def _conv_ln_relu_kernel(x_ref, w_ref, g_ref, b_ref, m_ref, o_ref, xpad_ref, patch_ref, *,
                         eps, kh, kw, pd, w_out, npix, base):
    """One block of `bsz` images per grid step.

    x_ref:     (bsz, C_in, npix)          raw flattened images (no halo)
    w_ref:     (C_out, KH*KW*C_pad)       conv weight, im2col-ordered (dy, dx, ci), zero-padded
    g_ref:     (C_out, 1) f32             LayerNorm gamma
    b_ref:     (C_out, 1) f32             LayerNorm beta
    m_ref:     (KW, npix)                 0/1 column-validity masks, one per dx
    o_ref:     (bsz, C_out, npix)         lane-dense output block
    xpad_ref:  (bsz, C_in, lpad)          VMEM scratch, zero halo + image interior
    patch_ref: (KH*KW*C_pad, bsz*npix)    VMEM im2col scratch (8-aligned row groups)
    """
    bsz, c_in, _ = x_ref.shape
    c_out = o_ref.shape[1]
    c_pad = patch_ref.shape[0] // (kh * kw)

    # In-kernel zero halo (replaces the old wrapper jnp.pad HBM round trip).  The interior
    # store starts at a 128-aligned lane offset, so it is a plain unmasked store.
    xpad_ref[...] = jnp.zeros_like(xpad_ref)
    xpad_ref[:, :, base:base + npix] = x_ref[...].astype(xpad_ref.dtype)

    # Zero the im2col scratch so the channel-padding rows (and any stale VMEM contents,
    # e.g. NaN bit patterns) contribute exactly 0 to the GEMM.
    patch_ref[...] = jnp.zeros_like(patch_ref)

    # Hoisted column masks: broadcast each needed 0/1 mask to (C_in, npix) exactly once.
    # For k=3 / pad=1 only dx=0 (col >= 1) and dx=2 (col < w-1) are non-trivial.
    masks = []
    for dx in range(kw):
        lo, hi = pd - dx, w_out + pd - dx
        if lo > 0 or hi < w_out:
            masks.append(jnp.broadcast_to(m_ref[dx:dx + 1, :], (c_in, npix)))
        else:
            masks.append(None)

    # Implicit im2col: each shifted slab is gathered exactly once.  Row over/underflow
    # lands in the zero halo; column over/underflow is zeroed by the multiplicative masks.
    # Stores land at sublane offsets that are multiples of 8 and lane offsets that are
    # multiples of npix (>=128), i.e. fully aligned masked stores.
    for b in range(bsz):
        for dy in range(kh):
            for dx in range(kw):
                tap = dy * kw + dx
                s = base + (dy - pd) * w_out + (dx - pd)       # static lane offset, >= 0
                xs = xpad_ref[b, :, s:s + npix]                # (C_in, npix)
                if masks[dx] is not None:
                    xs = xs * masks[dx]
                patch_ref[tap * c_pad:tap * c_pad + c_in,
                          b * npix:(b + 1) * npix] = xs

    # Single GEMM on the MXU (K = KH*KW*C_pad), f32 accumulation.
    acc = jnp.dot(w_ref[...], patch_ref[...],
                  preferred_element_type=jnp.float32)          # (C_out, bsz*npix)

    # LayerNorm over channels (sublane axis) per pixel (lane axis); biased variance with
    # eps inside the sqrt -- matches the PyTorch channels_first LayerNorm.  Stats in f32.
    u = jnp.mean(acc, axis=0, keepdims=True)
    d = acc - u
    var = jnp.mean(d * d, axis=0, keepdims=True)
    y = g_ref[...] * (d * jax.lax.rsqrt(var + eps)) + b_ref[...]
    y = jnp.maximum(y, 0.0)                                    # ReLU

    for b in range(bsz):
        o_ref[b] = y[:, b * npix:(b + 1) * npix].astype(o_ref.dtype)


def prepare_conv2d_block_params(weight, ln_gamma, ln_beta, *, height, width, padding=1,
                                compute_dtype=None):
    """One-time parameter/constant prep (keep off the per-call hot path).

    Returns prepared weights (im2col layout, channel axis zero-padded to a multiple of 8
    sublanes), f32 LayerNorm affine params, and the 0/1 column-validity masks.
    """
    c_out, c_in, kh, kw = weight.shape
    cdt = weight.dtype if compute_dtype is None else jnp.dtype(compute_dtype)
    h_out = height + 2 * padding - kh + 1
    w_out = width + 2 * padding - kw + 1
    npix = h_out * w_out

    c_pad = ((c_in + 7) // 8) * 8
    # (C_out, KH, KW, C_in) -> zero-pad channels -> (C_out, KH*KW*C_pad); K index ordering
    # (dy, dx, ci) matches the in-kernel im2col row-group layout.
    w_t = jnp.transpose(weight, (0, 2, 3, 1))
    w_t = jnp.pad(w_t, ((0, 0), (0, 0), (0, 0), (0, c_pad - c_in)))
    w2d = w_t.reshape(c_out, kh * kw * c_pad).astype(cdt)

    gamma2d = ln_gamma.reshape(c_out, 1).astype(jnp.float32)
    beta2d = ln_beta.reshape(c_out, 1).astype(jnp.float32)

    col = jnp.arange(npix, dtype=jnp.int32) % w_out
    masks = jnp.stack(
        [((col >= padding - dx) & (col < w_out + padding - dx)).astype(cdt)
         for dx in range(kw)])                                  # (KW, npix)

    return dict(w2d=w2d, gamma=gamma2d, beta=beta2d, masks=masks,
                c_in=c_in, c_out=c_out, kh=kh, kw=kw, padding=padding,
                height=height, width=width, compute_dtype=cdt)


def _pick_images_per_step(n, per_image_bytes, vmem_budget_bytes=8 << 20):
    """Largest divisor of n that keeps >= 2 grid steps (both v7x TensorCores get work)
    and stays far inside the scoped-VMEM limit of every TPU generation."""
    cap = max(1, vmem_budget_bytes // max(per_image_bytes, 1))
    best = 1
    for b in range(1, n // 2 + 1):
        if n % b == 0 and b <= cap:
            best = b
    return best


def conv2d_block_forward(x_nchw, params, *, stride=1, eps=1e-6, images_per_step=None):
    """Conv2dBlock forward: conv2d(bias=False) -> LayerNorm(channels_first) -> ReLU."""
    n, c_in, h, w = x_nchw.shape
    kh, kw, pd = params["kh"], params["kw"], params["padding"]
    c_out, cdt = params["c_out"], params["compute_dtype"]
    assert c_in == params["c_in"]
    assert (h, w) == (params["height"], params["width"])
    assert stride == 1, "fused implicit-GEMM path implements the module's stride=1 config"
    h_out, w_out = h + 2 * pd - kh + 1, w + 2 * pd - kw + 1
    assert (h_out, w_out) == (h, w), "fused path assumes 'same' convolution (k=3, pad=1)"

    npix = h_out * w_out
    left = pd * w_out + pd                              # halo needed before pixel 0
    right = (kh - 1 - pd) * w_out + (kw - 1 - pd)       # halo needed after the last pixel
    base = ((left + 127) // 128) * 128                  # 128-aligned interior start
    lpad = base + npix + right
    kdim_pad = params["w2d"].shape[1]
    c_pad = kdim_pad // (kh * kw)

    itemsize = jnp.dtype(cdt).itemsize
    per_image_bytes = (2 * c_in * npix * x_nchw.dtype.itemsize      # input block (x2 buffers)
                       + 2 * c_out * npix * x_nchw.dtype.itemsize   # output block (x2 buffers)
                       + c_in * lpad * itemsize                     # halo scratch
                       + kdim_pad * npix * itemsize                 # im2col scratch
                       + c_out * npix * 4)                          # f32 GEMM/LN values
    bsz = (_pick_images_per_step(n, per_image_bytes)
           if images_per_step is None else images_per_step)
    assert n % bsz == 0, (n, bsz)

    # Free reshape to (N, C_in, H*W); no pad / astype copy in the per-call path.
    x_flat = x_nchw.reshape(n, c_in, npix)

    kernel = functools.partial(_conv_ln_relu_kernel, eps=eps, kh=kh, kw=kw, pd=pd,
                               w_out=w_out, npix=npix, base=base)

    out = pl.pallas_call(
        kernel,
        out_shape=jax.ShapeDtypeStruct((n, c_out, npix), x_nchw.dtype),
        grid_spec=pltpu.PrefetchScalarGridSpec(
            num_scalar_prefetch=0,
            grid=(n // bsz,),
            in_specs=[
                pl.BlockSpec((bsz, c_in, npix), lambda i: (i, 0, 0)),
                pl.BlockSpec((c_out, kdim_pad), lambda i: (0, 0)),
                pl.BlockSpec((c_out, 1), lambda i: (0, 0)),
                pl.BlockSpec((c_out, 1), lambda i: (0, 0)),
                pl.BlockSpec((kw, npix), lambda i: (0, 0)),
            ],
            out_specs=pl.BlockSpec((bsz, c_out, npix), lambda i: (i, 0, 0)),
            scratch_shapes=[
                pltpu.VMEM((bsz, c_in, lpad), cdt),          # zero-halo input scratch
                pltpu.VMEM((kdim_pad, bsz * npix), cdt),     # im2col scratch
            ],
        ),
        compiler_params=pltpu.CompilerParams(
            dimension_semantics=("parallel",)),
    )(x_flat, params["w2d"], params["gamma"], params["beta"], params["masks"])

    # Output is already channel-major: pure reshape back to NCHW (no transpose).
    return out.reshape(n, c_out, h_out, w_out)


def _reference(x_nchw, weight, ln_gamma, ln_beta, *, stride=1, padding=1, eps=1e-6):
    y = jax.lax.conv_general_dilated(
        x_nchw.astype(jnp.float32), weight.astype(jnp.float32),
        window_strides=(stride, stride),
        padding=[(padding, padding), (padding, padding)],
        dimension_numbers=("NCHW", "OIHW", "NCHW"))
    u = y.mean(axis=1, keepdims=True)
    s = ((y - u) ** 2).mean(axis=1, keepdims=True)
    yn = (y - u) / jnp.sqrt(s + eps)
    yn = ln_gamma[None, :, None, None] * yn + ln_beta[None, :, None, None]
    return jnp.maximum(yn, 0.0)


if __name__ == "__main__":
    key = jax.random.PRNGKey(0)
    k_x, k_w, k_x2 = jax.random.split(key, 3)

    N, C_IN, H, W = 2, 4, 16, 16
    C_OUT, K = 8, 3

    x = jax.random.normal(k_x, (N, C_IN, H, W), dtype=jnp.float32)
    fan_in = C_IN * K * K
    bound = 1.0 / (fan_in ** 0.5)
    weight = jax.random.uniform(k_w, (C_OUT, C_IN, K, K), dtype=jnp.float32,
                                minval=-bound, maxval=bound)
    ln_gamma = jnp.ones((C_OUT,), dtype=jnp.float32)    # LayerNorm init: ones
    ln_beta = jnp.zeros((C_OUT,), dtype=jnp.float32)    # LayerNorm init: zeros

    # One-time parameter prep (kept out of the per-call hot path).
    params_f32 = prepare_conv2d_block_params(weight, ln_gamma, ln_beta,
                                             height=H, width=W, padding=1)

    ref = _reference(x, weight, ln_gamma, ln_beta, stride=1, padding=1)

    # f32 path (exact match to the reference); N=2 -> 2 parallel grid steps.
    out = conv2d_block_forward(x, params_f32)
    out = jax.block_until_ready(out)
    assert out.shape == (N, C_OUT, H, W), out.shape
    assert jnp.allclose(out, ref, atol=1e-4, rtol=1e-4), float(jnp.max(jnp.abs(out - ref)))

    # Batched-step path: N=4 -> 2 images per grid step, still 2 parallel steps.
    x4 = jax.random.normal(k_x2, (4, C_IN, H, W), dtype=jnp.float32)
    ref4 = _reference(x4, weight, ln_gamma, ln_beta, stride=1, padding=1)
    out4 = jax.block_until_ready(conv2d_block_forward(x4, params_f32))
    assert jnp.allclose(out4, ref4, atol=1e-4, rtol=1e-4), \
        float(jnp.max(jnp.abs(out4 - ref4)))

    # Optional bf16 MXU-operand path (LN stats stay f32).  Recommended on v6e/v7x only;
    # on v5e keep the default f32 path (no bf16 VPU, no bandwidth benefit at this size).
    params_bf16 = prepare_conv2d_block_params(weight, ln_gamma, ln_beta, height=H, width=W,
                                              padding=1, compute_dtype=jnp.bfloat16)
    out_bf16 = jax.block_until_ready(conv2d_block_forward(x, params_bf16))
    assert jnp.allclose(out_bf16, ref, atol=5e-2, rtol=5e-2), \
        float(jnp.max(jnp.abs(out_bf16 - ref)))

    print("KERNEL_OK")
</pallas_src>

<mosaic_0001>
module attributes {stable_mosaic.version = 11 : i64} {
  func.func @_conv_ln_relu_kernel(%arg0: i32, %arg1: memref<1x4x256xf32, #tpu.memory_space<vmem>>, %arg2: memref<8x72xf32, #tpu.memory_space<vmem>>, %arg3: memref<8x1xf32, #tpu.memory_space<vmem>>, %arg4: memref<8x1xf32, #tpu.memory_space<vmem>>, %arg5: memref<3x256xf32, #tpu.memory_space<vmem>>, %arg6: memref<1x8x256xf32, #tpu.memory_space<vmem>>, %arg7: memref<1x4x401xf32, #tpu.memory_space<vmem>>, %arg8: memref<72x256xf32, #tpu.memory_space<vmem>>) attributes {dimension_semantics = [#tpu.dimension_semantics<parallel>], iteration_bounds = array<i64: 2>, scalar_prefetch = 0 : i64, scratch_operands = 2 : i64, tpu.core_type = #tpu.core_type<tc>, window_params = [{transform_indices = @transform_0, window_bounds = array<i64: 1, 4, 256>}, {pipeline_mode = #tpu.pipeline_mode<synchronous>, transform_indices = @transform_1, window_bounds = array<i64: 8, 72>}, {pipeline_mode = #tpu.pipeline_mode<synchronous>, transform_indices = @transform_2, window_bounds = array<i64: 8, 1>}, {pipeline_mode = #tpu.pipeline_mode<synchronous>, transform_indices = @transform_3, window_bounds = array<i64: 8, 1>}, {pipeline_mode = #tpu.pipeline_mode<synchronous>, transform_indices = @transform_4, window_bounds = array<i64: 3, 256>}, {transform_indices = @transform_5, window_bounds = array<i64: 1, 8, 256>}]} {
    %cst = arith.constant 0.000000e+00 : f32
    %0 = vector.broadcast %cst : f32 to vector<1x4x401xf32>
    %c0 = arith.constant 0 : index
    %c0_0 = arith.constant 0 : index
    %c0_1 = arith.constant 0 : index
    %1 = vector.load %arg7[%c0, %c0_0, %c0_1] : memref<1x4x401xf32, #tpu.memory_space<vmem>>, vector<1x4x401xf32>
    tpu.vector_store %arg7[%c0, %c0_0, %c0_1], %0 {strides = array<i32>} : memref<1x4x401xf32, #tpu.memory_space<vmem>>, vector<1x4x401xf32>,
    %c0_2 = arith.constant 0 : index
    %c0_3 = arith.constant 0 : index
    %c0_4 = arith.constant 0 : index
    %2 = vector.load %arg1[%c0_2, %c0_3, %c0_4] : memref<1x4x256xf32, #tpu.memory_space<vmem>>, vector<1x4x256xf32>
    %c0_5 = arith.constant 0 : index
    %c0_6 = arith.constant 0 : index
    %c128 = arith.constant 128 : index
    %3 = vector.load %arg7[%c0_5, %c0_6, %c128] : memref<1x4x401xf32, #tpu.memory_space<vmem>>, vector<1x4x256xf32>
    tpu.vector_store %arg7[%c0_5, %c0_6, %c128], %2 {strides = array<i32>} : memref<1x4x401xf32, #tpu.memory_space<vmem>>, vector<1x4x256xf32>,
    %cst_7 = arith.constant 0.000000e+00 : f32
    %4 = vector.broadcast %cst_7 : f32 to vector<72x256xf32>
    %c0_8 = arith.constant 0 : index
    %c0_9 = arith.constant 0 : index
    %5 = vector.load %arg8[%c0_8, %c0_9] : memref<72x256xf32, #tpu.memory_space<vmem>>, vector<72x256xf32>
    tpu.vector_store %arg8[%c0_8, %c0_9], %4 {strides = array<i32>} : memref<72x256xf32, #tpu.memory_space<vmem>>, vector<72x256xf32>,
    %c0_10 = arith.constant 0 : index
    %c0_11 = arith.constant 0 : index
    %6 = vector.load %arg5[%c0_10, %c0_11] : memref<3x256xf32, #tpu.memory_space<vmem>>, vector<1x256xf32>
    %7 = vector.shape_cast %6 : vector<1x256xf32> to vector<1x256xf32>
    %8 = vector.broadcast %7 : vector<1x256xf32> to vector<4x256xf32>
    %c2 = arith.constant 2 : index
    %c0_12 = arith.constant 0 : index
    %9 = vector.load %arg5[%c2, %c0_12] : memref<3x256xf32, #tpu.memory_space<vmem>>, vector<1x256xf32>
    %10 = vector.shape_cast %9 : vector<1x256xf32> to vector<1x256xf32>
    %11 = vector.broadcast %10 : vector<1x256xf32> to vector<4x256xf32>
    %c0_13 = arith.constant 0 : index
    %c0_14 = arith.constant 0 : index
    %c111 = arith.constant 111 : index
    %12 = vector.load %arg7[%c0_13, %c0_14, %c111] : memref<1x4x401xf32, #tpu.memory_space<vmem>>, vector<1x4x256xf32>
    %13 = vector.shape_cast %12 : vector<1x4x256xf32> to vector<4x256xf32>
    %14 = arith.mulf %13, %8 : vector<4x256xf32>
    %c0_15 = arith.constant 0 : index
    %c0_16 = arith.constant 0 : index
    %15 = vector.load %arg8[%c0_15, %c0_16] : memref<72x256xf32, #tpu.memory_space<vmem>>, vector<4x256xf32>
    tpu.vector_store %arg8[%c0_15, %c0_16], %14 {strides = array<i32>} : memref<72x256xf32, #tpu.memory_space<vmem>>, vector<4x256xf32>,
    %c0_17 = arith.constant 0 : index
    %c0_18 = arith.constant 0 : index
    %c112 = arith.constant 112 : index
    %16 = vector.load %arg7[%c0_17, %c0_18, %c112] : memref<1x4x401xf32, #tpu.memory_space<vmem>>, vector<1x4x256xf32>
    %17 = vector.shape_cast %16 : vector<1x4x256xf32> to vector<4x256xf32>
    %c8 = arith.constant 8 : index
    %c0_19 = arith.constant 0 : index
    %18 = vector.load %arg8[%c8, %c0_19] : memref<72x256xf32, #tpu.memory_space<vmem>>, vector<4x256xf32>
    tpu.vector_store %arg8[%c8, %c0_19], %17 {strides = array<i32>} : memref<72x256xf32, #tpu.memory_space<vmem>>, vector<4x256xf32>,
    %c0_20 = arith.constant 0 : index
    %c0_21 = arith.constant 0 : index
    %c113 = arith.constant 113 : index
    %19 = vector.load %arg7[%c0_20, %c0_21, %c113] : memref<1x4x401xf32, #tpu.memory_space<vmem>>, vector<1x4x256xf32>
    %20 = vector.shape_cast %19 : vector<1x4x256xf32> to vector<4x256xf32>
    %21 = arith.mulf %20, %11 : vector<4x256xf32>
    %c16 = arith.constant 16 : index
    %c0_22 = arith.constant 0 : index
    %22 = vector.load %arg8[%c16, %c0_22] : memref<72x256xf32, #tpu.memory_space<vmem>>, vector<4x256xf32>
    tpu.vector_store %arg8[%c16, %c0_22], %21 {strides = array<i32>} : memref<72x256xf32, #tpu.memory_space<vmem>>, vector<4x256xf32>,
    %c0_23 = arith.constant 0 : index
    %c0_24 = arith.constant 0 : index
    %c127 = arith.constant 127 : index
    %23 = vector.load %arg7[%c0_23, %c0_24, %c127] : memref<1x4x401xf32, #tpu.memory_space<vmem>>, vector<1x4x256xf32>
    %24 = vector.shape_cast %23 : vector<1x4x256xf32> to vector<4x256xf32>
    %25 = arith.mulf %24, %8 : vector<4x256xf32>
    %c24 = arith.constant 24 : index
    %c0_25 = arith.constant 0 : index
    %26 = vector.load %arg8[%c24, %c0_25] : memref<72x256xf32, #tpu.memory_space<vmem>>, vector<4x256xf32>
    tpu.vector_store %arg8[%c24, %c0_25], %25 {strides = array<i32>} : memref<72x256xf32, #tpu.memory_space<vmem>>, vector<4x256xf32>,
    %c0_26 = arith.constant 0 : index
    %c0_27 = arith.constant 0 : index
    %c128_28 = arith.constant 128 : index
    %27 = vector.load %arg7[%c0_26, %c0_27, %c128_28] : memref<1x4x401xf32, #tpu.memory_space<vmem>>, vector<1x4x256xf32>
    %28 = vector.shape_cast %27 : vector<1x4x256xf32> to vector<4x256xf32>
    %c32 = arith.constant 32 : index
    %c0_29 = arith.constant 0 : index
    %29 = vector.load %arg8[%c32, %c0_29] : memref<72x256xf32, #tpu.memory_space<vmem>>, vector<4x256xf32>
    tpu.vector_store %arg8[%c32, %c0_29], %28 {strides = array<i32>} : memref<72x256xf32, #tpu.memory_space<vmem>>, vector<4x256xf32>,
    %c0_30 = arith.constant 0 : index
    %c0_31 = arith.constant 0 : index
    %c129 = arith.constant 129 : index
    %30 = vector.load %arg7[%c0_30, %c0_31, %c129] : memref<1x4x401xf32, #tpu.memory_space<vmem>>, vector<1x4x256xf32>
    %31 = vector.shape_cast %30 : vector<1x4x256xf32> to vector<4x256xf32>
    %32 = arith.mulf %31, %11 : vector<4x256xf32>
    %c40 = arith.constant 40 : index
    %c0_32 = arith.constant 0 : index
    %33 = vector.load %arg8[%c40, %c0_32] : memref<72x256xf32, #tpu.memory_space<vmem>>, vector<4x256xf32>
    tpu.vector_store %arg8[%c40, %c0_32], %32 {strides = array<i32>} : memref<72x256xf32, #tpu.memory_space<vmem>>, vector<4x256xf32>,
    %c0_33 = arith.constant 0 : index
    %c0_34 = arith.constant 0 : index
    %c143 = arith.constant 143 : index
    %34 = vector.load %arg7[%c0_33, %c0_34, %c143] : memref<1x4x401xf32, #tpu.memory_space<vmem>>, vector<1x4x256xf32>
    %35 = vector.shape_cast %34 : vector<1x4x256xf32> to vector<4x256xf32>
    %36 = arith.mulf %35, %8 : vector<4x256xf32>
    %c48 = arith.constant 48 : index
    %c0_35 = arith.constant 0 : index
    %37 = vector.load %arg8[%c48, %c0_35] : memref<72x256xf32, #tpu.memory_space<vmem>>, vector<4x256xf32>
    tpu.vector_store %arg8[%c48, %c0_35], %36 {strides = array<i32>} : memref<72x256xf32, #tpu.memory_space<vmem>>, vector<4x256xf32>,
    %c0_36 = arith.constant 0 : index
    %c0_37 = arith.constant 0 : index
    %c144 = arith.constant 144 : index
    %38 = vector.load %arg7[%c0_36, %c0_37, %c144] : memref<1x4x401xf32, #tpu.memory_space<vmem>>, vector<1x4x256xf32>
    %39 = vector.shape_cast %38 : vector<1x4x256xf32> to vector<4x256xf32>
    %c56 = arith.constant 56 : index
    %c0_38 = arith.constant 0 : index
    %40 = vector.load %arg8[%c56, %c0_38] : memref<72x256xf32, #tpu.memory_space<vmem>>, vector<4x256xf32>
    tpu.vector_store %arg8[%c56, %c0_38], %39 {strides = array<i32>} : memref<72x256xf32, #tpu.memory_space<vmem>>, vector<4x256xf32>,
    %c0_39 = arith.constant 0 : index
    %c0_40 = arith.constant 0 : index
    %c145 = arith.constant 145 : index
    %41 = vector.load %arg7[%c0_39, %c0_40, %c145] : memref<1x4x401xf32, #tpu.memory_space<vmem>>, vector<1x4x256xf32>
    %42 = vector.shape_cast %41 : vector<1x4x256xf32> to vector<4x256xf32>
    %43 = arith.mulf %42, %11 : vector<4x256xf32>
    %c64 = arith.constant 64 : index
    %c0_41 = arith.constant 0 : index
    %44 = vector.load %arg8[%c64, %c0_41] : memref<72x256xf32, #tpu.memory_space<vmem>>, vector<4x256xf32>
    tpu.vector_store %arg8[%c64, %c0_41], %43 {strides = array<i32>} : memref<72x256xf32, #tpu.memory_space<vmem>>, vector<4x256xf32>,
    %c0_42 = arith.constant 0 : index
    %c0_43 = arith.constant 0 : index
    %45 = vector.load %arg2[%c0_42, %c0_43] : memref<8x72xf32, #tpu.memory_space<vmem>>, vector<8x72xf32>
    %c0_44 = arith.constant 0 : index
    %c0_45 = arith.constant 0 : index
    %46 = vector.load %arg8[%c0_44, %c0_45] : memref<72x256xf32, #tpu.memory_space<vmem>>, vector<72x256xf32>
    %cst_46 = arith.constant dense<0.000000e+00> : vector<8x256xf32>
    %47 = tpu.matmul %45, %46, %cst_46 {dimension_numbers = #tpu.dot_dimension_numbers<[1], [0], [0], [1], [0, 0, 1, 1], [], []>} : vector<8x72xf32>, vector<72x256xf32>, vector<8x256xf32> -> vector<8x256xf32>
    %cst_47 = arith.constant dense<0.000000e+00> : vector<256xf32>
    %48 = vector.multi_reduction <add>, %47, %cst_47 [0] : vector<8x256xf32> to vector<256xf32>
    %49 = vector.shape_cast %48 : vector<256xf32> to vector<1x256xf32>
    %cst_48 = arith.constant 8.000000e+00 : f32
    %50 = vector.broadcast %cst_48 : f32 to vector<1x256xf32>
    %51 = arith.divf %49, %50 : vector<1x256xf32>
    %52 = vector.broadcast %51 : vector<1x256xf32> to vector<8x256xf32>
    %53 = arith.subf %47, %52 : vector<8x256xf32>
    %54 = arith.mulf %53, %53 : vector<8x256xf32>
    %cst_49 = arith.constant dense<0.000000e+00> : vector<256xf32>
    %55 = vector.multi_reduction <add>, %54, %cst_49 [0] : vector<8x256xf32> to vector<256xf32>
    %56 = vector.shape_cast %55 : vector<256xf32> to vector<1x256xf32>
    %cst_50 = arith.constant 8.000000e+00 : f32
    %57 = vector.broadcast %cst_50 : f32 to vector<1x256xf32>
    %58 = arith.divf %56, %57 : vector<1x256xf32>
    %c0_51 = arith.constant 0 : index
    %c0_52 = arith.constant 0 : index
    %59 = vector.load %arg3[%c0_51, %c0_52] : memref<8x1xf32, #tpu.memory_space<vmem>>, vector<8x1xf32>
    %cst_53 = arith.constant 9.99999997E-7 : f32
    %60 = vector.broadcast %cst_53 : f32 to vector<1x256xf32>
    %61 = arith.addf %58, %60 : vector<1x256xf32>
    %62 = math.rsqrt %61 : vector<1x256xf32>
    %63 = vector.broadcast %62 : vector<1x256xf32> to vector<8x256xf32>
    %64 = arith.mulf %53, %63 : vector<8x256xf32>
    %65 = vector.broadcast %59 : vector<8x1xf32> to vector<8x256xf32>
    %66 = arith.mulf %65, %64 : vector<8x256xf32>
    %c0_54 = arith.constant 0 : index
    %c0_55 = arith.constant 0 : index
    %67 = vector.load %arg4[%c0_54, %c0_55] : memref<8x1xf32, #tpu.memory_space<vmem>>, vector<8x1xf32>
    %68 = vector.broadcast %67 : vector<8x1xf32> to vector<8x256xf32>
    %69 = arith.addf %66, %68 : vector<8x256xf32>
    %cst_56 = arith.constant 0.000000e+00 : f32
    %70 = vector.broadcast %cst_56 : f32 to vector<8x256xf32>
    %71 = arith.maximumf %69, %70 : vector<8x256xf32>
    %c0_57 = arith.constant 0 : index
    %c0_58 = arith.constant 0 : index
    %c0_59 = arith.constant 0 : index
    %72 = vector.load %arg6[%c0_57, %c0_58, %c0_59] : memref<1x8x256xf32, #tpu.memory_space<vmem>>, vector<1x8x256xf32>
    %73 = vector.shape_cast %72 : vector<1x8x256xf32> to vector<8x256xf32>
    %74 = vector.shape_cast %71 : vector<8x256xf32> to vector<1x8x256xf32>
    tpu.vector_store %arg6[%c0_57, %c0_58, %c0_59], %74 {strides = array<i32>} : memref<1x8x256xf32, #tpu.memory_space<vmem>>, vector<1x8x256xf32>,
    return
  }
  func.func @transform_0(%arg0: i32) -> (i32, i32, i32) {
    %c0_i32 = arith.constant 0 : i32
    %c0_i32_0 = arith.constant 0 : i32
    %c0_i32_1 = arith.constant 0 : i32
    return %arg0, %c0_i32, %c0_i32_0 : i32, i32, i32
  }
  func.func @transform_1(%arg0: i32) -> (i32, i32) {
    %c0_i32 = arith.constant 0 : i32
    %c0_i32_0 = arith.constant 0 : i32
    %c0_i32_1 = arith.constant 0 : i32
    return %c0_i32, %c0_i32_0 : i32, i32
  }
  func.func @transform_2(%arg0: i32) -> (i32, i32) {
    %c0_i32 = arith.constant 0 : i32
    %c0_i32_0 = arith.constant 0 : i32
    %c0_i32_1 = arith.constant 0 : i32
    return %c0_i32, %c0_i32_0 : i32, i32
  }
  func.func @transform_3(%arg0: i32) -> (i32, i32) {
    %c0_i32 = arith.constant 0 : i32
    %c0_i32_0 = arith.constant 0 : i32
    %c0_i32_1 = arith.constant 0 : i32
    return %c0_i32, %c0_i32_0 : i32, i32
  }
  func.func @transform_4(%arg0: i32) -> (i32, i32) {
    %c0_i32 = arith.constant 0 : i32
    %c0_i32_0 = arith.constant 0 : i32
    %c0_i32_1 = arith.constant 0 : i32
    return %c0_i32, %c0_i32_0 : i32, i32
  }
  func.func @transform_5(%arg0: i32) -> (i32, i32, i32) {
    %c0_i32 = arith.constant 0 : i32
    %c0_i32_0 = arith.constant 0 : i32
    %c0_i32_1 = arith.constant 0 : i32
    return %arg0, %c0_i32, %c0_i32_0 : i32, i32, i32
  }
}

</mosaic_0001>

<bundles_post_ra>
// kernel: tpu_custom_call.1
= control target key start
LH: loop header
LB: loop body
LE: loop exit
PB: predicated region body
PF: predicated region fallthrough
CT: control target
= control target key end

     0   :  { %10 = vsyncpa [#allocation5], 0  ;;  %s1171_s0 = inlined_call_operand.vmem [shape: f32[2,4,256], index: 0, kind: input, shape index: {}]   ;;  %s1172_s1 = inlined_call_operand.hbm [shape: f32[8,72], index: 1, kind: input, shape index: {}]   ;;  %s1173_s2 = inlined_call_operand.vmem [shape: f32[8,1], index: 2, kind: input, shape index: {}]   ;;  %s1174_s3 = inlined_call_operand.vmem [shape: f32[8,1], index: 3, kind: input, shape index: {}]   ;;  %s1175_s4 = inlined_call_operand.vmem [shape: f32[3,256], index: 4, kind: input, shape index: {}]   ;;  %s1176_s5 = inlined_call_operand.hbm [shape: f32[2,8,256], index: 5, kind: output, shape index: {}]  }
   0x1   :  { %11 = vsyncpa [#allocation6], 0 }
   0x2   :  { %13 = vsyncpa [#allocation6 + $0x1], 0  ;;  %s961_s18 = smov 0   ;;  %s963_s19 = smov 0  }
   0x3   :  { %s965_s20 = smov 0   ;;  %s967_s21 = smov 0  }
   0x4 LB: > { %s982_s22 = sadd.s32 4294967295, %s917_s21   ;;  %s721_s23 = sadd.s32 4294967294, %s917_s21   ;;  %s917_s21 = sphi %s967_s21, %s1192_s21   ;;  %s913_s20 = sphi %s965_s20, %s1191_s20   ;;  %s909_s19 = sphi %s963_s19, %s1190_s19   ;;  %s905_s18 = sphi %s961_s18, %s1189_s18  }
   0x5   : > { %s986_s24 = sadd.s32 1, %s917_s21   ;;  %s136_s25 = sadd.s32 1, %s913_s20 }
   0x6   : > { %s133_s26 = ssub.s32 %s917_s21, %s986_s24  ;;  %p146_p0 = scmp.ne.s32.totalorder %s913_s20, %s909_s19 }
   0x7   : > { %p134_p1 = scmp.eq.s32.totalorder %s133_s26, 0  ;;  %p147_p2 = scmp.eq.s32.totalorder %s982_s22, 1 }
   0x8   : > { %p152_p3 = scmp.ne.s32.totalorder %s909_s19, %s905_s18  ;;  %p153_p4 = scmp.eq.s32.totalorder %s721_s23, 1 }
   0x9   : > { %s997_s27 = scalar_select %p134_p1, %s913_s20, %s136_s25  }
   0xa   : > { %p999_p5 = por %p147_p2, %p146_p0  ;;  %p1003_p6 = por %p153_p4, %p152_p3 }
   0xb   : > { %p722_p7 = scmp.ge.s32.totalorder %s917_s21, 1  ;;  %p160_p8 = scmp.lt.s32.totalorder %s917_s21, 3 }
   0xc   : > { %s1180_s28 = scalar_select %p999_p5, 1, 0 }
   0xd   : > { %s1181_s29 = scalar_select %p1003_p6, 1, 0 }
   0xe   : > { %p1177_p9 = scmp.eq.s32.totalorder %s982_s22, 0  ;;  %p1010_p10 = pnand %p722_p7, %p160_p8 }
   0xf   : > { %s919_s6 = smov [#allocation4]   ;;  %s823_s11 = scalar_lea.hbm %s1172_s1, 128 }
  0x10   : > { %s1182_s30 = scalar_select %p1010_p10, 1, 0 }
  0x11   : > { %s173_s7 = sshll.u32 %s919_s6, 4  ;;  %p761_p11 = pneg %p1010_p10  ;;  %s174_s7 = int_to_ptr.vmem [resolvable:$true] %s173_s7 }
  0x12   : > { %p824_p13 = scmp.ne.s32.totalorder %s1172_s1, %s823_s11  ;;  %p830_p3 = scmp.lt.u32.totalorder %s823_s11, %s1172_s1 }
  0x13   : > { %p1018_p12 = pnand %p1177_p9, %p761_p11 }
  0x15   : > { %p825_p0 = pneg %p1018_p12 }
  0x17   : > { %p826_p1 = pnand %p825_p0, %p824_p13 }
  0x19   : > { %p827_p2 = pneg %p826_p1 }
  0x1b   : > { %p832_p4 = pnand %p830_p3, %p827_p2 }
  0x1d   : > { %835 = shalt.err (!%p832_p4)
}
  0x1e   : > { %s836_s16 = scalar_lea.vmem %s174_s7, 128  ;;  %p844_p9 = scmp.lt.s32.totalorder %s174_s7, %s174_s7 }
  0x1f   : > { %p837_p7 = scmp.ne.s32.totalorder %s174_s7, %s836_s16  ;;  %p845_p6 = scmp.lt.s32.totalorder %s836_s16, %s836_s16 }
  0x21   : > { %p839_p8 = pnand %p837_p7, %p825_p0  ;;  %p846_p5 = por %p845_p6, %p844_p9 }
  0x23   : > { %p840_p11 = pneg %p839_p8 }
  0x25   : > { %p847_p10 = pnand %p846_p5, %p840_p11 }
  0x27   : > { %850 = shalt.err (!%p847_p10)
}
  0x28   : > { %764 = dma.hbm_to_vmem [thread:$0]  (!%p1018_p12), %s1172_s1, 128, %s174_s7, [#allocation5]  }
  0x29   : > { %p1184_p13 = scmp.ne.s32.totalorder %s1182_s30, 0 }
  0x2a   : > { %p1185_p1 = scmp.eq.s32.totalorder (!%p1184_p13), %s982_s22, 0 }
  0x2b   : > { %203 = sbr.rel (%p1184_p13) target bundleno = 635 (0x27b), region = 40 }
  0x32   : > { %896 = dma.done.wait (%p1185_p1), [#allocation5], 128   ;;  %p1186_p0 = pmov %p1185_p1 }
  0x33   : > { %v263_v0 = vlaneseq  ;;  %vm237_vm0 = vcmask 1043456   ;;  %v920_v1 = vmov 0.0   ;;  %vm238_vm1 = vcmask 138244   ;;  %p231_p5 = scmp.lt.s32.totalorder %s982_s22, 1  ;;  %s921_s12 = smov 111  }
  0x34   : > { %898 = vsyncadd (%p1186_p0), [#allocation5], 4294967168  ;;  %236 = vst [vmem:[#allocation2] sm:$0xff] %v920_v1  ;;  %569 = vmatprep.mubr.f32.mxu0 %v920_v1  ;;  %v261_v5 = vld [vmem:[%s1175_s4] ss:$4 sm:$0x3] }
  0x35   : > { %243 = vst [vmem:[#allocation3] sm:$0xff] %v920_v1  ;;  %244 = vst [vmem:[#allocation3 + $0x8] sm:$0xff] %v920_v1  ;;  %v264_v2 = vshrl.u32 %v263_v0, 7  ;;  %s232_s25 = scalar_select %p231_p5, %s982_s22, 1  ;;  %vm288_vm3 = vcmask 908288   ;;  %vm321_vm4 = vcmask 130048  }
  0x36   : > { %245 = vst [vmem:[#allocation3 + $0x10] sm:$0xff] %v920_v1  ;;  %246 = vst [vmem:[#allocation3 + $0x18] sm:$0xff] %v920_v1  ;;  %v730_v6 = vld [vmem:[%s1175_s4 + $0x2] ss:$4 sm:$0x3]  ;;  %s922_s13 = smov 127  }
  0x37   : > { %247 = vst [vmem:[#allocation3 + $0x20] sm:$0xff] %v920_v1  ;;  %248 = vst [vmem:[#allocation3 + $0x28] sm:$0xff] %v920_v1  ;;  %v265_v3 = vsub.s32 0, %v264_v2  ;;  %v269_v4 = vsub.s32 1, %v264_v2  ;;  %s737_s8 = sshll.u32 %s232_s25, 3  ;;  %s923_s14 = smov 113  }
  0x38   : > { %249 = vst [vmem:[#allocation3 + $0x30] sm:$0xff] %v920_v1  ;;  %250 = vst [vmem:[#allocation3 + $0x38] sm:$0xff] %v920_v1  ;;  %s235_s11 = scalar_lea.vmem %s1171_s0, %s737_s8  ;;  %s924_s15 = smov 1   ;;  %vm334_vm5 = vcmask 924672   ;;  %vm361_vm6 = vcmask 1039360   ;;  %vm349_vm7 = vcmask 121856  }
  0x39   : > { %251 = vst [vmem:[#allocation3 + $0x40] sm:$0xff] %v920_v1  ;;  %252 = vst [vmem:[#allocation3 + $0x48] sm:$0xff] %v920_v1  ;;  %v266_v7 = vrot.slane %v261_v5, %v265_v3  ;;  %v270_v8 = vrot.slane %v261_v5, %v269_v4  ;;  %v277_v9 = vrot.slane %v730_v6, %v265_v3  ;;  %v1057_v12 = vld [vmem:[%s235_s11] sm:$0xff]  ;;  %s925_s16 = smov 15   ;;  %s926_s17 = smov 17   ;;  %vm376_vm8 = vcmask 7168  }
  0x3a   : > { %253 = vst [vmem:[#allocation3 + $0x50] sm:$0xff] %v920_v1  ;;  %254 = vst [vmem:[#allocation3 + $0x58] sm:$0xff] %v920_v1  ;;  %v281_v10 = vrot.slane %v730_v6, %v269_v4  ;;  %v443_v13 = vcombine.high %v1057_v12, %v1057_v12  ;;  %s927_s23 = smov 16   ;;  %s928_s25 = smov 112   ;;  %vm303_vm9 = vcmask 138240   ;;  %v623_v2 = vld [vmem:[%s1174_s3] sm:$0xff] }
  0x3b   : > { %255 = vst [vmem:[#allocation3 + $0x60] sm:$0xff] %v920_v1  ;;  %256 = vst [vmem:[#allocation3 + $0x68] sm:$0xff] %v920_v1  ;;  %v284_v11 = vcombine.low %v266_v7, %v270_v8  ;;  %v929_v3 = vmov 0   ;;  %v609_v4 = vld [vmem:[%s1173_s2] sm:$0xff]  ;;  %vm450_vm10 = vcmask 916480   ;;  %vm501_vm11 = vcmask 588800  }
  0x3c   : > { %257 = vst [vmem:[#allocation3 + $0x70] sm:$0xff] %v920_v1  ;;  %258 = vst [vmem:[#allocation3 + $0x78] sm:$0xff] %v920_v1  ;;  %v330_v14 = vcombine.low %v277_v9, %v281_v10  ;;  %816 = vset.pattern.permute.xlu1 %v929_v3  ;;  %815 = vset.pattern.permute.xlu0 %v929_v3  ;;  %s228_s8 = sand.u32 1, %s909_s19   ;;  %s738_s10 = sshll.u32 %s982_s22, 8 }
  0x3d   : > { %259 = vst [vmem:[#allocation3 + $0x80] sm:$0xff] %v920_v1  ;;  %260 = vst [vmem:[#allocation3 + $0x88] sm:$0xff] %v920_v1  ;;  %285 = vrot.lane.b32.xlu0 %v284_v11, %s921_s12  ;;  %358 = vrot.lane.b32.xlu1 %v284_v11, %s922_s13  ;;  %s727_s9 = sshll.u32 %s228_s8, 4  ;;  %p1187_p9 = scmp.ne.s32.totalorder %s1180_s28, 0 }
  0x3e   : > { %vm239_vm2 = vmor %vm238_vm1, %vm237_vm0  ;;  %387 = vst [vmem:[#allocation3 + $0x40] sm:$0xf] %v1057_v12  ;;  %s230_s11 = scalar_lea.vmem [#allocation7], %s727_s9  ;;  %s930_s22 = smov [#allocation7]  }
  0x3f   : > { %240 = vst.msk [vmem:[#allocation2 + $0x8] sm:$0xff] %vm239_vm2, %v920_v1  ;;  %388 = vst [vmem:[#allocation3 + $0x48] sm:$0xf] %v443_v13 }
  0x40   : > { %242 = vst [vmem:[#allocation2 + $0x4] sm:$0xff] %v1057_v12 }
  0x41   : > { %331 = vrot.lane.b32.xlu0 %v330_v14, %s923_s14  ;;  %391 = vrot.lane.b32.xlu1 %v330_v14, %s924_s15 }
  0x45   : > { %416 = vrot.lane.b32.xlu0 %v284_v11, %s925_s16  ;;  %459 = vrot.lane.b32.xlu1 %v330_v14, %s926_s17 }
  0x46   : > { %v415_v31 = vld [vmem:[#allocation2 + $0xc] sm:$0xf] }
  0x47   : > { %v310_v15 = vld [vmem:[#allocation2] sm:$0xff]  ;;  %v311_v17 = vld [vmem:[#allocation2 + $0x8] sm:$0xf]  ;;  %v390_v36 = vld [vmem:[#allocation2 + $0xc] sm:$0xf] }
  0x48   : > { %v314_v16 = vcombine.high %v310_v15, %v310_v15  ;;  %v283_v19 = vld [vmem:[#allocation2 + $0x8] sm:$0xf]  ;;  %v440_v63 = vld [vmem:[#allocation2 + $0xc] sm:$0xf] }
  0x49   : > { %319 = vrot.lane.b32.xlu1 %v311_v17, %s927_s23  ;;  %v329_v24 = vld [vmem:[#allocation2 + $0x8] sm:$0xf]  ;;  %v458_v0 = vld [vmem:[#allocation2 + $0xc] sm:$0xf] }
  0x4a   : > { %317 = vrot.lane.b32.xlu0 %v314_v16, %s927_s23  ;;  %v357_v28 = vld [vmem:[#allocation2 + $0x8] sm:$0xf] }
  0x4d   : > { %315 = vrot.lane.b32.xlu1 %v310_v15, %s927_s23  ;;  %s855_s23 = sshll.u32 %s930_s22, 4  ;;  %s856_s23 = int_to_ptr.vmem [resolvable:$false] %s855_s23 }
  0x51   : > { %446 = vrot.lane.b32.xlu1 %v443_v13, %s928_s25 }
  0xaf   : > { %v286_v18 = vpop.permute.xlu0 %285  ;;  %v359_v20 = vpop.permute.xlu1 %358 }
  0xb0   : > { %v287_v21 = vrot.slane %v286_v18, 4  ;;  %v360_v27 = vrot.slane %v359_v20, 4 }
  0xb2   : > { %v293_v22 = vmul.f32 %v287_v21, %v283_v19  ;;  %v366_v33 = vmul.f32 %v360_v27, %v357_v28  ;;  %v289_v38 = vsel %vm288_vm3, %v287_v21, %v286_v18  ;;  %v362_v45 = vsel %vm361_vm6, %v360_v27, %v359_v20 }
  0xb3   : > { %v332_v23 = vpop.permute.xlu0 %331  ;;  %v392_v25 = vpop.permute.xlu1 %391  ;;  %v292_v43 = vmul.f32 %v310_v15, %v289_v38  ;;  %v365_v50 = vmul.f32 %v362_v45, %v310_v15 }
  0xb4   : > { %v333_v26 = vrot.slane %v332_v23, 4  ;;  %301 = vrot.lane.b32.xlu1 %v293_v22, %s926_s17  ;;  %v393_v35 = vrot.slane %v392_v25, 4 }
  0xb5   : > { %v296_v58 = vcombine.high %v292_v43, %v292_v43  ;;  %v369_v61 = vcombine.high %v365_v50, %v365_v50 }
  0xb6   : > { %v339_v29 = vmul.f32 %v333_v26, %v329_v24  ;;  %v398_v41 = vmul.f32 %v393_v35, %v390_v36  ;;  %v335_v44 = vsel %vm334_vm5, %v333_v26, %v332_v23  ;;  %v394_v52 = vsel %vm376_vm8, %v393_v35, %v392_v25 }
  0xb7   : > { %v417_v30 = vpop.permute.xlu0 %416  ;;  %v460_v32 = vpop.permute.xlu1 %459  ;;  %v338_v49 = vmul.f32 %v335_v44, %v310_v15  ;;  %v397_v55 = vmul.f32 %v394_v52, %v1057_v12 }
  0xb8   : > { %v418_v34 = vrot.slane %v417_v30, 4  ;;  %347 = vrot.lane.b32.xlu1 %v339_v29, %s925_s16  ;;  %v461_v48 = vrot.slane %v460_v32, 4 }
  0xb9   : > { %v342_v60 = vcombine.high %v338_v49, %v338_v49  ;;  %v401_v62 = vcombine.high %v397_v55, %v397_v55 }
  0xba   : > { %v423_v37 = vmul.f32 %v418_v34, %v415_v31  ;;  %v419_v51 = vsel %vm349_vm7, %v418_v34, %v417_v30  ;;  %v462_v53 = vsel %vm303_vm9, %v461_v48, %v460_v32  ;;  %v466_v1 = vmul.f32 %v461_v48, %v458_v0  ;;  %v492_v48 = vld [vmem:[#allocation3 + $0x48] sm:$0xff] }
  0xbb   : > { %v320_v39 = vpop.permute.xlu1 %319  ;;  %v422_v54 = vmul.f32 %v419_v51, %v1057_v12  ;;  %v465_v56 = vmul.f32 %v462_v53, %v1057_v12 }
  0xbc   : > { %v318_v40 = vpop.permute.xlu0 %317  ;;  %431 = vrot.lane.b32.xlu0 %v423_v37, %s923_s14  ;;  %374 = vrot.lane.b32.xlu1 %v366_v33, %s924_s15 }
  0xbd   : > { %v323_v42 = vsel %vm321_vm4, %v318_v40, %v320_v39  ;;  %v426_v57 = vcombine.high %v422_v54, %v422_v54  ;;  %v469_v59 = vcombine.high %v465_v56, %v465_v56 }
  0xbe   : > { %327 = vst [vmem:[#allocation3 + $0x18] sm:$0xf] %v323_v42 }
  0xbf   : > { %v316_v46 = vpop.permute.xlu1 %315 }
  0xc0   : > { %406 = vrot.lane.b32.xlu1 %v398_v41, %s922_s13  ;;  %297 = vrot.lane.b32.xlu0 %v292_v43, %s926_s17  ;;  %v322_v47 = vsel %vm321_vm4, %v316_v46, %v318_v40 }
  0xc1   : > { %326 = vst [vmem:[#allocation3 + $0x10] sm:$0xf] %v322_v47 }
  0xc3   : > { %v1108_v5 = vpop.permute.xlu1 %446 }
  0xc4   : > { %370 = vrot.lane.b32.xlu1 %v365_v50, %s924_s15  ;;  %343 = vrot.lane.b32.xlu0 %v338_v49, %s925_s16  ;;  %v491_v49 = vld [vmem:[#allocation3 + $0x40] sm:$0xff] }
  0xc5   : > { %v486_v27 = vld [vmem:[#allocation3 + $0x18] sm:$0xff] }
  0xc8   : > { %427 = vrot.lane.b32.xlu1 %v422_v54, %s923_s14  ;;  %402 = vrot.lane.b32.xlu0 %v397_v55, %s922_s13  ;;  %v485_v33 = vld [vmem:[#allocation3 + $0x10] sm:$0xff] }
  0xcc   : > { %429 = vrot.lane.b32.xlu1 %v426_v57, %s923_s14  ;;  %299 = vrot.lane.b32.xlu0 %v296_v58, %s926_s17 }
  0xd0   : > { %345 = vrot.lane.b32.xlu0 %v342_v60, %s925_s16  ;;  %472 = vrot.lane.b32.xlu1 %v469_v59, %s921_s12  ;;  %s636_s16 = scalar_lea.sflag [#allocation6], %s228_s8 }
  0xd4   : > { %372 = vrot.lane.b32.xlu0 %v369_v61, %s924_s15  ;;  %470 = vrot.lane.b32.xlu1 %v465_v56, %s921_s12  ;;  %s1129_s15 = scalar_lea.hbm %s1176_s5, %s738_s10 }
  0xd8   : > { %404 = vrot.lane.b32.xlu0 %v401_v62, %s922_s13  ;;  %626 = vperm.xlu1 %816, %v623_v2  }
  0xdc   : > { %448 = vrot.lane.b32.xlu0 %v440_v63, %s928_s25 }
  0xe0   : > { %444 = vrot.lane.b32.xlu0 %v1057_v12, %s928_s25  ;;  %s857_s25 = scalar_lea.vmem %s856_s23, 512 }
  0xe4   : > { %474 = vrot.lane.b32.xlu0 %v466_v1, %s921_s12  ;;  %v482_v1 = vld [vmem:[#allocation4] sm:$0xff]  ;;  %s650_s12 = sshll.u32 %s230_s11, 4  ;;  %s1131_s12 = int_to_ptr.vmem [resolvable:$true] %s650_s12 }
  0xe5   : > { %s851_s17 = scalar_lea.vmem %s1131_s12, 256  ;;  %p858_p2 = scmp.lt.s32.totalorder %s1131_s12, %s856_s23 }
  0xe6   : > { %p852_p6 = scmp.ne.s32.totalorder %s1131_s12, %s851_s17  ;;  %p859_p3 = scmp.lt.s32.totalorder %s857_s25, %s851_s17 }
  0xe8   : > { %618 = vperm.xlu0 %815, %v609_v4   ;;  %p853_p10 = pnand %p852_p6, %p1187_p9  ;;  %p860_p4 = por %p859_p3, %p858_p2 }
  0xea   : > { %p854_p12 = pneg %p853_p10 }
  0xec   : > { %p861_p7 = pnand %p860_p4, %p854_p12 }
 0x126   : > { %v302_v6 = vpop.permute.xlu1 %301 }
 0x12a   : > { %v348_v7 = vpop.permute.xlu1 %347 }
 0x12e   : > { %v432_v8 = vpop.permute.xlu0 %431  ;;  %v375_v9 = vpop.permute.xlu1 %374 }
 0x132   : > { %v407_v10 = vpop.permute.xlu1 %406  ;;  %v298_v11 = vpop.permute.xlu0 %297 }
 0x136   : > { %v371_v12 = vpop.permute.xlu1 %370  ;;  %v344_v13 = vpop.permute.xlu0 %343 }
 0x13a   : > { %v428_v14 = vpop.permute.xlu1 %427  ;;  %v403_v15 = vpop.permute.xlu0 %402 }
 0x13e   : > { %v430_v16 = vpop.permute.xlu1 %429  ;;  %v300_v17 = vpop.permute.xlu0 %299 }
 0x13f   : > { %v433_v18 = vsel %vm334_vm5, %v428_v14, %v430_v16  ;;  %v434_v19 = vsel %vm334_vm5, %v430_v16, %v432_v8  ;;  %v304_v20 = vsel %vm303_vm9, %v298_v11, %v300_v17  ;;  %v305_v21 = vsel %vm303_vm9, %v300_v17, %v302_v6 }
 0x140   : > { %437 = vst [vmem:[#allocation3 + $0x60] sm:$0xf] %v433_v18  ;;  %438 = vst [vmem:[#allocation3 + $0x68] sm:$0xf] %v434_v19 }
 0x141   : > { %308 = vst [vmem:[#allocation3] sm:$0xf] %v304_v20  ;;  %309 = vst [vmem:[#allocation3 + $0x8] sm:$0xf] %v305_v21 }
 0x142   : > { %v346_v22 = vpop.permute.xlu0 %345  ;;  %v473_v23 = vpop.permute.xlu1 %472 }
 0x143   : > { %v350_v24 = vsel %vm349_vm7, %v344_v13, %v346_v22  ;;  %v351_v25 = vsel %vm349_vm7, %v346_v22, %v348_v7 }
 0x144   : > { %354 = vst [vmem:[#allocation3 + $0x20] sm:$0xf] %v350_v24  ;;  %355 = vst [vmem:[#allocation3 + $0x28] sm:$0xf] %v351_v25 }
 0x146   : > { %v373_v26 = vpop.permute.xlu0 %372  ;;  %v471_v28 = vpop.permute.xlu1 %470 }
 0x147   : > { %v377_v29 = vsel %vm376_vm8, %v371_v12, %v373_v26  ;;  %v378_v30 = vsel %vm376_vm8, %v373_v26, %v375_v9  ;;  %v476_v34 = vsel %vm288_vm3, %v471_v28, %v473_v23  ;;  %v496_v58 = vld [vmem:[#allocation3 + $0x68] sm:$0xff]  ;;  %v495_v61 = vld [vmem:[#allocation3 + $0x60] sm:$0xff] }
 0x148   : > { %v484_v31 = vld [vmem:[#allocation3 + $0x8] sm:$0xff]  ;;  %v483_v32 = vld [vmem:[#allocation3] sm:$0xff]  ;;  %381 = vst [vmem:[#allocation3 + $0x30] sm:$0xf] %v377_v29  ;;  %382 = vst [vmem:[#allocation3 + $0x38] sm:$0xf] %v378_v30 }
 0x149   : > { %v739_v35 = vpack.c.bf16 %v486_v27, %v484_v31  ;;  %v741_v36 = vpack.c.bf16 %v485_v33, %v483_v32  ;;  %480 = vst [vmem:[#allocation3 + $0x80] sm:$0xf] %v476_v34 }
 0x14a   : > { %v405_v37 = vpop.permute.xlu0 %404 }
 0x14b   : > { %740 = vmatprep.subr.bf16.mxu0 %v739_v35  ;;  %v408_v38 = vsel %vm361_vm6, %v403_v15, %v405_v37  ;;  %v409_v39 = vsel %vm361_vm6, %v405_v37, %v407_v10  ;;  %v488_v41 = vld [vmem:[#allocation3 + $0x28] sm:$0xff]  ;;  %v487_v44 = vld [vmem:[#allocation3 + $0x20] sm:$0xff] }
 0x14c   : > { %742 = vmatpush1.bf16.msra.mxu0 %v741_v36  ;;  %412 = vst [vmem:[#allocation3 + $0x50] sm:$0xf] %v408_v38  ;;  %413 = vst [vmem:[#allocation3 + $0x58] sm:$0xf] %v409_v39 }
 0x14e   : > { %v449_v40 = vpop.permute.xlu0 %448 }
 0x14f   : > { %v452_v42 = vsel %vm450_vm10, %v1108_v5, %v449_v40  ;;  %v490_v43 = vld [vmem:[#allocation3 + $0x38] sm:$0xff]  ;;  %v489_v45 = vld [vmem:[#allocation3 + $0x30] sm:$0xff] }
 0x150   : > { %456 = vst [vmem:[#allocation3 + $0x78] sm:$0xf] %v452_v42  ;;  %v743_v46 = vpack.c.bf16 %v490_v43, %v488_v41  ;;  %v745_v47 = vpack.c.bf16 %v489_v45, %v487_v44  ;;  %v499_v2 = vld [vmem:[#allocation3 + $0x80] sm:$0xff] }
 0x152   : > { %744 = vmatprep.subr.bf16.mxu0 %v743_v46  ;;  %v445_v50 = vpop.permute.xlu0 %444 }
 0x153   : > { %v451_v51 = vsel %vm450_vm10, %v445_v50, %v1108_v5  ;;  %746 = vmatpush1.bf16.msra.mxu0 %v745_v47  ;;  %v494_v52 = vld [vmem:[#allocation3 + $0x58] sm:$0xff]  ;;  %v493_v53 = vld [vmem:[#allocation3 + $0x50] sm:$0xff] }
 0x154   : > { %455 = vst [vmem:[#allocation3 + $0x70] sm:$0xf] %v451_v51  ;;  %v747_v54 = vpack.c.bf16 %v494_v52, %v492_v48  ;;  %v749_v55 = vpack.c.bf16 %v493_v53, %v491_v49 }
 0x156   : > { %748 = vmatprep.subr.bf16.mxu0 %v747_v54  ;;  %v475_v56 = vpop.permute.xlu0 %474 }
 0x157   : > { %v477_v57 = vsel %vm288_vm3, %v473_v23, %v475_v56  ;;  %750 = vmatpush1.bf16.msra.mxu0 %v749_v55  ;;  %v498_v59 = vld [vmem:[#allocation3 + $0x78] sm:$0xff]  ;;  %v627_v44 = vpop.permute.xlu1 %626 }
 0x158   : > { %481 = vst [vmem:[#allocation3 + $0x88] sm:$0xf] %v477_v57  ;;  %v751_v60 = vpack.c.bf16 %v498_v59, %v496_v58 }
 0x15a   : > { %752 = vmatprep.subr.bf16.mxu0 %v751_v60 }
 0x15b   : > { %v497_v62 = vld [vmem:[#allocation3 + $0x70] sm:$0xff] }
 0x15c   : > { %v753_v63 = vpack.c.bf16 %v497_v62, %v495_v61 }
 0x15e   : > { %754 = vmatpush1.bf16.msra.mxu0 %v753_v63 }
 0x15f   : > { %v500_v0 = vld [vmem:[#allocation3 + $0x88] sm:$0xff] }
 0x160   : > { %521 = vmatprep.subr.mxu0 %v500_v0 }
 0x162   : > { %522 = vmatpush1.msra.mxu0 %v499_v2 }
 0x163   : > { %731 = vmatmul.mubr.msk.f32.vlgmr.msra.gmra.mrb[0].mxu0 %vm501_vm11, %v482_v1 }
 0x167   : > { %v619_v40 = vpop.permute.xlu0 %618 }
 0x236   : > { %v571_v3 = vpop.f32.mrb[0].mxu0 }
 0x237   : > { %v576_v4 = vrot.slane %v571_v3, 4  ;;  %v573_v5 = vpop.f32.mrb[1].mxu0 }
 0x238   : > { %v582_v6 = vrot.slane %v573_v5, 4 }
 0x239   : > { %v577_v7 = vadd.f32 %v576_v4, %v571_v3 }
 0x23a   : > { %v583_v8 = vadd.f32 %v582_v6, %v573_v5 }
 0x23b   : > { %v578_v9 = vrot.slane %v577_v7, 2 }
 0x23c   : > { %v584_v10 = vrot.slane %v583_v8, 2 }
 0x23d   : > { %v579_v11 = vadd.f32 %v578_v9, %v577_v7 }
 0x23e   : > { %v585_v12 = vadd.f32 %v584_v10, %v583_v8 }
 0x23f   : > { %v580_v13 = vrot.slane %v579_v11, 1 }
 0x240   : > { %v586_v14 = vrot.slane %v585_v12, 1 }
 0x241   : > { %v581_v15 = vadd.f32 %v580_v13, %v579_v11 }
 0x242   : > { %v587_v16 = vadd.f32 %v586_v14, %v585_v12 }
 0x243   : > { %v589_v17 = vmul.f32 0.125, %v581_v15 }
 0x244   : > { %v590_v18 = vmul.f32 0.125, %v587_v16 }
 0x245   : > { %v591_v19 = vsub.f32 %v571_v3, %v589_v17 }
 0x246   : > { %v592_v20 = vsub.f32 %v573_v5, %v590_v18 }
 0x247   : > { %v593_v21 = vmul.f32 %v591_v19, %v591_v19 }
 0x248   : > { %v594_v22 = vmul.f32 %v592_v20, %v592_v20 }
 0x249   : > { %v595_v23 = vrot.slane %v593_v21, 4 }
 0x24a   : > { %v601_v24 = vrot.slane %v594_v22, 4 }
 0x24b   : > { %v596_v25 = vadd.f32 %v595_v23, %v593_v21 }
 0x24c   : > { %v602_v26 = vadd.f32 %v601_v24, %v594_v22 }
 0x24d   : > { %v597_v27 = vrot.slane %v596_v25, 2 }
 0x24e   : > { %v603_v28 = vrot.slane %v602_v26, 2 }
 0x24f   : > { %v598_v29 = vadd.f32 %v597_v27, %v596_v25 }
 0x250   : > { %v604_v30 = vadd.f32 %v603_v28, %v602_v26 }
 0x251   : > { %v599_v31 = vrot.slane %v598_v29, 1 }
 0x252   : > { %v605_v32 = vrot.slane %v604_v30, 1 }
 0x253   : > { %v600_v33 = vadd.f32 %v599_v31, %v598_v29 }
 0x254   : > { %v606_v34 = vadd.f32 %v605_v32, %v604_v30 }
 0x255   : > { %v607_v35 = vmul.f32 0.125, %v600_v33 }
 0x256   : > { %v608_v36 = vmul.f32 0.125, %v606_v34 }
 0x257   : > { %v610_v37 = vadd.f32 1e-06, %v607_v35 }
 0x258   : > { %v611_v38 = vadd.f32 1e-06, %v608_v36 }
 0x259   : > { %819 = vrsqrt.f32 %v610_v37 }
 0x25a   : > { %821 = vrsqrt.f32 %v611_v38 }
 0x263   : > { %v820_v39 = vpop.eup %819 }
 0x264   : > { %v822_v41 = vpop.eup %821  ;;  %v614_v42 = vmul.f32 %v820_v39, %v591_v19 }
 0x265   : > { %v615_v43 = vmul.f32 %v822_v41, %v592_v20 }
 0x266   : > { %v621_v45 = vmul.f32 %v619_v40, %v614_v42 }
 0x267   : > { %v622_v46 = vmul.f32 %v619_v40, %v615_v43 }
 0x268   : > { %v629_v47 = vadd.f32 %v627_v44, %v621_v45 }
 0x269   : > { %v630_v48 = vadd.f32 %v627_v44, %v622_v46 }
 0x26a   : > { %v631_v49 = vmax.f32 %v629_v47, 0.0 }
 0x26b   : > { %v632_v50 = vmax.f32 %v630_v48, 0.0 }
 0x26c   : > { %633 = vst [vmem:[%s230_s11] sm:$0xff] %v631_v49 }
 0x26d   : > { %634 = vst [vmem:[%s230_s11 + $0x8] sm:$0xff] %v632_v50 }
 0x26e   : > { %864 = shalt.err (!%p861_p7)
}
 0x26f   : > { %s865_s26 = scalar_lea.hbm %s1129_s15, 256  ;;  %s869_s7 = scalar_lea.hbm %s1176_s5, 512 }
 0x270   : > { %p866_p8 = scmp.ne.s32.totalorder %s1129_s15, %s865_s26  ;;  %p870_p1 = scmp.lt.u32.totalorder %s1129_s15, %s1176_s5 }
 0x271   : > { %p871_p0 = scmp.lt.u32.totalorder %s869_s7, %s865_s26  ;;  %p873_p6 = scmp.lt.u32.totalorder %s865_s26, %s1129_s15 }
 0x272   : > { %p867_p11 = pnand %p866_p8, %p1187_p9 }
 0x273   : > { %p872_p5 = por %p871_p0, %p870_p1 }
 0x274   : > { %p868_p13 = pneg %p867_p11 }
 0x275   : > { %p874_p10 = por %p873_p6, %p872_p5 }
 0x277   : > { %p875_p12 = pnand %p874_p10, %p868_p13 }
 0x279   : > { %878 = shalt.err (!%p875_p12)
}
 0x27a   : > { %759 = dma.vmem_to_hbm [thread:$0]  (%p1187_p9), %s1131_s12, 256, %s1129_s15, %s636_s16  }
 0x27b PF: > { %p771_p2 = scmp.ge.s32.totalorder %s917_s21, 2  ;;  %s662_s10 = sand.u32 1, %s905_s18  }
 0x27c   : > { %p1188_p3 = scmp.ne.s32.totalorder %s1181_s29, 0  ;;  %s663_s11 = scalar_lea.sflag [#allocation6], %s662_s10 }
 0x27e   : > { %p766_p4 = pnand %p771_p2, %p1188_p3 }
 0x280   : > { %900 = dma.done.wait (!%p766_p4), %s663_s11, 256  }
 0x281   : > { %902 = vsyncadd (!%p766_p4), %s663_s11, 4294967040  ;;  %p16_p7 = scmp.ge.s32.totalorder %s986_s24, 4   ;;  %s1189_s18 = smov %s909_s19 }
 0x282   : > { %s1190_s19 = smov %s913_s20  ;;  %s1191_s20 = smov %s997_s27 }
 0x283   : > { %s1192_s21 = smov %s986_s24  ;;  %18 = sbr.rel (!%p16_p7) target bundleno = 4 (0x4), region = 81 }
 0x28a   :  { %668 = vsyncpa [#allocation5], 1 }
 0x28b   :  { %670 = vsyncpa [#allocation5 + $0x1], 1 }
 0x28c   :  { %671 = vsyncpa [#allocation6], 1 }
 0x28d   :  { %673 = vsyncpa [#allocation6 + $0x1], 1 }

</bundles_post_ra>
